<compile_context>
chip_gen: v6e
topology: v6e:2x2x1
jax: 0.10.0
libtpu: 0.0.40
codegen_flags: <defaults>
</compile_context>

<pallas_src>
import jax
import jax.numpy as jnp
from jax.experimental import pallas as pl
from jax.experimental.pallas import tpu as pltpu


def _sigmoid(z):
    # logistic via tanh: one EUP transcendental, no VPU divide.
    return 0.5 * (jnp.tanh(0.5 * z) + 1.0)


def _lstm_kernel(x_ref, wih_ref, whh_ref, b_ref, wlin_ref, blin_ref, out_ref):
    """Full LSTM recurrence + fused output Linear in one invocation.

    x_ref    : (S, B, 1)  time-major inputs (input_size == 1)
    wih_ref  : (1, 4H)    input->gate weights, gate order i|f|g|o
    whh_ref  : (H, 4H)    hidden->gate weights, gate order i|f|g|o
    b_ref    : (1, 4H)    b_ih + b_hh
    wlin_ref : (H, O)     final Linear weight (transposed)
    blin_ref : (1, O)     final Linear bias
    out_ref  : (B, O)
    """
    S, B, _ = x_ref.shape
    H = whh_ref.shape[0]

    # Hoisted, h-independent input projection: one vectorized op producing the
    # whole (S, B, 4H) gate-input table (biases folded in).
    xproj = x_ref[...] * wih_ref[...] + b_ref[...]        # (S, B, 4H)

    whh = whh_ref[...]                                    # (H, 4H)

    h = jnp.zeros((B, H), jnp.float32)
    c = jnp.zeros((B, H), jnp.float32)

    # Statically unrolled recurrence (S is a small compile-time constant):
    # one lane-dense (B,H)@(H,4H) MXU matmul + 2 transcendental passes per step.
    for t in range(S):
        gates = xproj[t] + jnp.dot(h, whh, preferred_element_type=jnp.float32)  # (B, 4H)
        sig = _sigmoid(gates)              # one pass over the full fused tile
        i_g = sig[:, 0 * H:1 * H]
        f_g = sig[:, 1 * H:2 * H]
        o_g = sig[:, 3 * H:4 * H]
        g_g = jnp.tanh(gates[:, 2 * H:3 * H])
        c = f_g * c + i_g * g_g
        h = o_g * jnp.tanh(c)

    # Fused final Linear(hidden -> output); single unconditional write.
    out_ref[...] = (jnp.dot(h, wlin_ref[...], preferred_element_type=jnp.float32)
                    + blin_ref[...])


def lstm_forward(input_seq, params):
    """input_seq: (batch, seq) f32  ->  (batch,) f32"""
    B, S = input_seq.shape
    H = params["whh"].shape[0]
    O = params["wlin"].shape[1]

    # torch: input_seq.view(seq_len, batch_size, 1)  (row-major reinterpretation)
    x = input_seq.reshape(S, B, 1).astype(jnp.float32)

    # Note: the torch module carries self.hidden_cell across forward calls;
    # here (as at module construction) the recurrence starts from zeros.
    out = pl.pallas_call(
        _lstm_kernel,
        out_shape=jax.ShapeDtypeStruct((B, O), jnp.float32),
        in_specs=[pl.BlockSpec(memory_space=pltpu.MemorySpace.VMEM)
                  for _ in range(6)],
        out_specs=pl.BlockSpec(memory_space=pltpu.MemorySpace.VMEM),
    )(x, params["wih"], params["whh"], params["b"],
      params["wlin"], params["blin"])

    return out[:, 0]


def init_params(key, input_size=1, hidden=32, output=1):
    """Deterministic synthetic weights, shapes matching nn.LSTM / nn.Linear."""
    bound = 1.0 / float(hidden) ** 0.5
    ks = jax.random.split(key, 6)
    w_ih = jax.random.uniform(ks[0], (4 * hidden, input_size), jnp.float32, -bound, bound)
    w_hh = jax.random.uniform(ks[1], (4 * hidden, hidden), jnp.float32, -bound, bound)
    b_ih = jax.random.uniform(ks[2], (4 * hidden,), jnp.float32, -bound, bound)
    b_hh = jax.random.uniform(ks[3], (4 * hidden,), jnp.float32, -bound, bound)
    w_lin = jax.random.uniform(ks[4], (output, hidden), jnp.float32, -bound, bound)
    b_lin = jax.random.uniform(ks[5], (output,), jnp.float32, -bound, bound)
    return {
        # gates packed along a single lane-dense 4H axis (order i|f|g|o),
        # pre-transposed so the kernel does x @ W / h @ W directly.
        "wih": w_ih.T,                                    # (1, 4H)
        "whh": w_hh.T,                                    # (H, 4H)
        "b": (b_ih + b_hh).reshape(1, 4 * hidden),        # (1, 4H)
        "wlin": w_lin.T,                                  # (H, O)
        "blin": b_lin.reshape(1, output),                 # (1, O)
    }


def lstm_ref(input_seq, params):
    """Pure-JAX reference (lax.scan) for correctness checking."""
    B, S = input_seq.shape
    H = params["whh"].shape[0]
    x = input_seq.reshape(S, B, 1).astype(jnp.float32)

    def step(carry, x_t):
        h, c = carry
        gates = x_t @ params["wih"] + h @ params["whh"] + params["b"]  # (B, 4H)
        i = _sigmoid(gates[:, 0 * H:1 * H])
        f = _sigmoid(gates[:, 1 * H:2 * H])
        g = jnp.tanh(gates[:, 2 * H:3 * H])
        o = _sigmoid(gates[:, 3 * H:4 * H])
        c = f * c + i * g
        h = o * jnp.tanh(c)
        return (h, c), None

    init = (jnp.zeros((B, H), jnp.float32), jnp.zeros((B, H), jnp.float32))
    (h, _), _ = jax.lax.scan(step, init, x)
    return (h @ params["wlin"] + params["blin"])[:, 0]


if __name__ == "__main__":
    B, S, H = 8, 10, 32          # small shapes: batch=8, seq=10, hidden=32
    key = jax.random.PRNGKey(0)
    k_x, k_p = jax.random.split(key)

    input_seq = jax.random.normal(k_x, (B, S), jnp.float32)
    params = init_params(k_p, input_size=1, hidden=H, output=1)

    out = lstm_forward(input_seq, params)
    out = jax.block_until_ready(out)

    ref = lstm_ref(input_seq, params)
    assert out.shape == (B,), out.shape
    assert jnp.allclose(out, ref, atol=1e-4, rtol=1e-4), (out, ref)
    print("KERNEL_OK")
</pallas_src>

<mosaic_0001>
module attributes {stable_mosaic.version = 11 : i64} {
  func.func @_lstm_kernel(%arg0: memref<10x8x1xf32, #tpu.memory_space<vmem>>, %arg1: memref<1x128xf32, #tpu.memory_space<vmem>>, %arg2: memref<32x128xf32, #tpu.memory_space<vmem>>, %arg3: memref<1x128xf32, #tpu.memory_space<vmem>>, %arg4: memref<32x1xf32, #tpu.memory_space<vmem>>, %arg5: memref<1x1xf32, #tpu.memory_space<vmem>>, %arg6: memref<8x1xf32, #tpu.memory_space<vmem>>) attributes {dimension_semantics = [], scalar_prefetch = 0 : i64, scratch_operands = 0 : i64, tpu.core_type = #tpu.core_type<tc>} {
    %c0 = arith.constant 0 : index
    %c0_0 = arith.constant 0 : index
    %c0_1 = arith.constant 0 : index
    %0 = vector.load %arg0[%c0, %c0_0, %c0_1] : memref<10x8x1xf32, #tpu.memory_space<vmem>>, vector<10x8x1xf32>
    %c0_2 = arith.constant 0 : index
    %c0_3 = arith.constant 0 : index
    %1 = vector.load %arg1[%c0_2, %c0_3] : memref<1x128xf32, #tpu.memory_space<vmem>>, vector<1x128xf32>
    %2 = vector.shape_cast %1 : vector<1x128xf32> to vector<1x1x128xf32>
    %3 = vector.broadcast %0 : vector<10x8x1xf32> to vector<10x8x128xf32>
    %4 = vector.broadcast %2 : vector<1x1x128xf32> to vector<10x8x128xf32>
    %5 = arith.mulf %3, %4 : vector<10x8x128xf32>
    %c0_4 = arith.constant 0 : index
    %c0_5 = arith.constant 0 : index
    %6 = vector.load %arg3[%c0_4, %c0_5] : memref<1x128xf32, #tpu.memory_space<vmem>>, vector<1x128xf32>
    %7 = vector.shape_cast %6 : vector<1x128xf32> to vector<1x1x128xf32>
    %8 = vector.broadcast %7 : vector<1x1x128xf32> to vector<10x8x128xf32>
    %9 = arith.addf %5, %8 : vector<10x8x128xf32>
    %c0_6 = arith.constant 0 : index
    %c0_7 = arith.constant 0 : index
    %10 = vector.load %arg2[%c0_6, %c0_7] : memref<32x128xf32, #tpu.memory_space<vmem>>, vector<32x128xf32>
    %cst = arith.constant 0.000000e+00 : f32
    %11 = vector.broadcast %cst : f32 to vector<8x32xf32>
    %cst_8 = arith.constant 0.000000e+00 : f32
    %12 = vector.broadcast %cst_8 : f32 to vector<8x32xf32>
    %13 = vector.extract_strided_slice %9 {offsets = [0, 0, 0], sizes = [1, 8, 128], strides = [1, 1, 1]} : vector<10x8x128xf32> to vector<1x8x128xf32>
    %14 = vector.shape_cast %13 : vector<1x8x128xf32> to vector<8x128xf32>
    %cst_9 = arith.constant dense<0.000000e+00> : vector<8x128xf32>
    %15 = tpu.matmul %11, %10, %cst_9 {dimension_numbers = #tpu.dot_dimension_numbers<[1], [0], [0], [1], [0, 0, 1, 1], [], []>} : vector<8x32xf32>, vector<32x128xf32>, vector<8x128xf32> -> vector<8x128xf32>
    %16 = arith.addf %14, %15 : vector<8x128xf32>
    %cst_10 = arith.constant 5.000000e-01 : f32
    %17 = vector.broadcast %cst_10 : f32 to vector<8x128xf32>
    %18 = arith.mulf %17, %16 : vector<8x128xf32>
    %19 = math.tanh %18 : vector<8x128xf32>
    %cst_11 = arith.constant 1.000000e+00 : f32
    %20 = vector.broadcast %cst_11 : f32 to vector<8x128xf32>
    %21 = arith.addf %19, %20 : vector<8x128xf32>
    %cst_12 = arith.constant 5.000000e-01 : f32
    %22 = vector.broadcast %cst_12 : f32 to vector<8x128xf32>
    %23 = arith.mulf %22, %21 : vector<8x128xf32>
    %24 = vector.extract_strided_slice %23 {offsets = [0, 0], sizes = [8, 32], strides = [1, 1]} : vector<8x128xf32> to vector<8x32xf32>
    %25 = vector.extract_strided_slice %23 {offsets = [0, 32], sizes = [8, 32], strides = [1, 1]} : vector<8x128xf32> to vector<8x32xf32>
    %26 = vector.extract_strided_slice %23 {offsets = [0, 96], sizes = [8, 32], strides = [1, 1]} : vector<8x128xf32> to vector<8x32xf32>
    %27 = vector.extract_strided_slice %16 {offsets = [0, 64], sizes = [8, 32], strides = [1, 1]} : vector<8x128xf32> to vector<8x32xf32>
    %28 = math.tanh %27 : vector<8x32xf32>
    %29 = arith.mulf %25, %12 : vector<8x32xf32>
    %30 = arith.mulf %24, %28 : vector<8x32xf32>
    %31 = arith.addf %29, %30 : vector<8x32xf32>
    %32 = math.tanh %31 : vector<8x32xf32>
    %33 = arith.mulf %26, %32 : vector<8x32xf32>
    %34 = vector.extract_strided_slice %9 {offsets = [1, 0, 0], sizes = [1, 8, 128], strides = [1, 1, 1]} : vector<10x8x128xf32> to vector<1x8x128xf32>
    %35 = vector.shape_cast %34 : vector<1x8x128xf32> to vector<8x128xf32>
    %cst_13 = arith.constant dense<0.000000e+00> : vector<8x128xf32>
    %36 = tpu.matmul %33, %10, %cst_13 {dimension_numbers = #tpu.dot_dimension_numbers<[1], [0], [0], [1], [0, 0, 1, 1], [], []>} : vector<8x32xf32>, vector<32x128xf32>, vector<8x128xf32> -> vector<8x128xf32>
    %37 = arith.addf %35, %36 : vector<8x128xf32>
    %cst_14 = arith.constant 5.000000e-01 : f32
    %38 = vector.broadcast %cst_14 : f32 to vector<8x128xf32>
    %39 = arith.mulf %38, %37 : vector<8x128xf32>
    %40 = math.tanh %39 : vector<8x128xf32>
    %cst_15 = arith.constant 1.000000e+00 : f32
    %41 = vector.broadcast %cst_15 : f32 to vector<8x128xf32>
    %42 = arith.addf %40, %41 : vector<8x128xf32>
    %cst_16 = arith.constant 5.000000e-01 : f32
    %43 = vector.broadcast %cst_16 : f32 to vector<8x128xf32>
    %44 = arith.mulf %43, %42 : vector<8x128xf32>
    %45 = vector.extract_strided_slice %44 {offsets = [0, 0], sizes = [8, 32], strides = [1, 1]} : vector<8x128xf32> to vector<8x32xf32>
    %46 = vector.extract_strided_slice %44 {offsets = [0, 32], sizes = [8, 32], strides = [1, 1]} : vector<8x128xf32> to vector<8x32xf32>
    %47 = vector.extract_strided_slice %44 {offsets = [0, 96], sizes = [8, 32], strides = [1, 1]} : vector<8x128xf32> to vector<8x32xf32>
    %48 = vector.extract_strided_slice %37 {offsets = [0, 64], sizes = [8, 32], strides = [1, 1]} : vector<8x128xf32> to vector<8x32xf32>
    %49 = math.tanh %48 : vector<8x32xf32>
    %50 = arith.mulf %46, %31 : vector<8x32xf32>
    %51 = arith.mulf %45, %49 : vector<8x32xf32>
    %52 = arith.addf %50, %51 : vector<8x32xf32>
    %53 = math.tanh %52 : vector<8x32xf32>
    %54 = arith.mulf %47, %53 : vector<8x32xf32>
    %55 = vector.extract_strided_slice %9 {offsets = [2, 0, 0], sizes = [1, 8, 128], strides = [1, 1, 1]} : vector<10x8x128xf32> to vector<1x8x128xf32>
    %56 = vector.shape_cast %55 : vector<1x8x128xf32> to vector<8x128xf32>
    %cst_17 = arith.constant dense<0.000000e+00> : vector<8x128xf32>
    %57 = tpu.matmul %54, %10, %cst_17 {dimension_numbers = #tpu.dot_dimension_numbers<[1], [0], [0], [1], [0, 0, 1, 1], [], []>} : vector<8x32xf32>, vector<32x128xf32>, vector<8x128xf32> -> vector<8x128xf32>
    %58 = arith.addf %56, %57 : vector<8x128xf32>
    %cst_18 = arith.constant 5.000000e-01 : f32
    %59 = vector.broadcast %cst_18 : f32 to vector<8x128xf32>
    %60 = arith.mulf %59, %58 : vector<8x128xf32>
    %61 = math.tanh %60 : vector<8x128xf32>
    %cst_19 = arith.constant 1.000000e+00 : f32
    %62 = vector.broadcast %cst_19 : f32 to vector<8x128xf32>
    %63 = arith.addf %61, %62 : vector<8x128xf32>
    %cst_20 = arith.constant 5.000000e-01 : f32
    %64 = vector.broadcast %cst_20 : f32 to vector<8x128xf32>
    %65 = arith.mulf %64, %63 : vector<8x128xf32>
    %66 = vector.extract_strided_slice %65 {offsets = [0, 0], sizes = [8, 32], strides = [1, 1]} : vector<8x128xf32> to vector<8x32xf32>
    %67 = vector.extract_strided_slice %65 {offsets = [0, 32], sizes = [8, 32], strides = [1, 1]} : vector<8x128xf32> to vector<8x32xf32>
    %68 = vector.extract_strided_slice %65 {offsets = [0, 96], sizes = [8, 32], strides = [1, 1]} : vector<8x128xf32> to vector<8x32xf32>
    %69 = vector.extract_strided_slice %58 {offsets = [0, 64], sizes = [8, 32], strides = [1, 1]} : vector<8x128xf32> to vector<8x32xf32>
    %70 = math.tanh %69 : vector<8x32xf32>
    %71 = arith.mulf %67, %52 : vector<8x32xf32>
    %72 = arith.mulf %66, %70 : vector<8x32xf32>
    %73 = arith.addf %71, %72 : vector<8x32xf32>
    %74 = math.tanh %73 : vector<8x32xf32>
    %75 = arith.mulf %68, %74 : vector<8x32xf32>
    %76 = vector.extract_strided_slice %9 {offsets = [3, 0, 0], sizes = [1, 8, 128], strides = [1, 1, 1]} : vector<10x8x128xf32> to vector<1x8x128xf32>
    %77 = vector.shape_cast %76 : vector<1x8x128xf32> to vector<8x128xf32>
    %cst_21 = arith.constant dense<0.000000e+00> : vector<8x128xf32>
    %78 = tpu.matmul %75, %10, %cst_21 {dimension_numbers = #tpu.dot_dimension_numbers<[1], [0], [0], [1], [0, 0, 1, 1], [], []>} : vector<8x32xf32>, vector<32x128xf32>, vector<8x128xf32> -> vector<8x128xf32>
    %79 = arith.addf %77, %78 : vector<8x128xf32>
    %cst_22 = arith.constant 5.000000e-01 : f32
    %80 = vector.broadcast %cst_22 : f32 to vector<8x128xf32>
    %81 = arith.mulf %80, %79 : vector<8x128xf32>
    %82 = math.tanh %81 : vector<8x128xf32>
    %cst_23 = arith.constant 1.000000e+00 : f32
    %83 = vector.broadcast %cst_23 : f32 to vector<8x128xf32>
    %84 = arith.addf %82, %83 : vector<8x128xf32>
    %cst_24 = arith.constant 5.000000e-01 : f32
    %85 = vector.broadcast %cst_24 : f32 to vector<8x128xf32>
    %86 = arith.mulf %85, %84 : vector<8x128xf32>
    %87 = vector.extract_strided_slice %86 {offsets = [0, 0], sizes = [8, 32], strides = [1, 1]} : vector<8x128xf32> to vector<8x32xf32>
    %88 = vector.extract_strided_slice %86 {offsets = [0, 32], sizes = [8, 32], strides = [1, 1]} : vector<8x128xf32> to vector<8x32xf32>
    %89 = vector.extract_strided_slice %86 {offsets = [0, 96], sizes = [8, 32], strides = [1, 1]} : vector<8x128xf32> to vector<8x32xf32>
    %90 = vector.extract_strided_slice %79 {offsets = [0, 64], sizes = [8, 32], strides = [1, 1]} : vector<8x128xf32> to vector<8x32xf32>
    %91 = math.tanh %90 : vector<8x32xf32>
    %92 = arith.mulf %88, %73 : vector<8x32xf32>
    %93 = arith.mulf %87, %91 : vector<8x32xf32>
    %94 = arith.addf %92, %93 : vector<8x32xf32>
    %95 = math.tanh %94 : vector<8x32xf32>
    %96 = arith.mulf %89, %95 : vector<8x32xf32>
    %97 = vector.extract_strided_slice %9 {offsets = [4, 0, 0], sizes = [1, 8, 128], strides = [1, 1, 1]} : vector<10x8x128xf32> to vector<1x8x128xf32>
    %98 = vector.shape_cast %97 : vector<1x8x128xf32> to vector<8x128xf32>
    %cst_25 = arith.constant dense<0.000000e+00> : vector<8x128xf32>
    %99 = tpu.matmul %96, %10, %cst_25 {dimension_numbers = #tpu.dot_dimension_numbers<[1], [0], [0], [1], [0, 0, 1, 1], [], []>} : vector<8x32xf32>, vector<32x128xf32>, vector<8x128xf32> -> vector<8x128xf32>
    %100 = arith.addf %98, %99 : vector<8x128xf32>
    %cst_26 = arith.constant 5.000000e-01 : f32
    %101 = vector.broadcast %cst_26 : f32 to vector<8x128xf32>
    %102 = arith.mulf %101, %100 : vector<8x128xf32>
    %103 = math.tanh %102 : vector<8x128xf32>
    %cst_27 = arith.constant 1.000000e+00 : f32
    %104 = vector.broadcast %cst_27 : f32 to vector<8x128xf32>
    %105 = arith.addf %103, %104 : vector<8x128xf32>
    %cst_28 = arith.constant 5.000000e-01 : f32
    %106 = vector.broadcast %cst_28 : f32 to vector<8x128xf32>
    %107 = arith.mulf %106, %105 : vector<8x128xf32>
    %108 = vector.extract_strided_slice %107 {offsets = [0, 0], sizes = [8, 32], strides = [1, 1]} : vector<8x128xf32> to vector<8x32xf32>
    %109 = vector.extract_strided_slice %107 {offsets = [0, 32], sizes = [8, 32], strides = [1, 1]} : vector<8x128xf32> to vector<8x32xf32>
    %110 = vector.extract_strided_slice %107 {offsets = [0, 96], sizes = [8, 32], strides = [1, 1]} : vector<8x128xf32> to vector<8x32xf32>
    %111 = vector.extract_strided_slice %100 {offsets = [0, 64], sizes = [8, 32], strides = [1, 1]} : vector<8x128xf32> to vector<8x32xf32>
    %112 = math.tanh %111 : vector<8x32xf32>
    %113 = arith.mulf %109, %94 : vector<8x32xf32>
    %114 = arith.mulf %108, %112 : vector<8x32xf32>
    %115 = arith.addf %113, %114 : vector<8x32xf32>
    %116 = math.tanh %115 : vector<8x32xf32>
    %117 = arith.mulf %110, %116 : vector<8x32xf32>
    %118 = vector.extract_strided_slice %9 {offsets = [5, 0, 0], sizes = [1, 8, 128], strides = [1, 1, 1]} : vector<10x8x128xf32> to vector<1x8x128xf32>
    %119 = vector.shape_cast %118 : vector<1x8x128xf32> to vector<8x128xf32>
    %cst_29 = arith.constant dense<0.000000e+00> : vector<8x128xf32>
    %120 = tpu.matmul %117, %10, %cst_29 {dimension_numbers = #tpu.dot_dimension_numbers<[1], [0], [0], [1], [0, 0, 1, 1], [], []>} : vector<8x32xf32>, vector<32x128xf32>, vector<8x128xf32> -> vector<8x128xf32>
    %121 = arith.addf %119, %120 : vector<8x128xf32>
    %cst_30 = arith.constant 5.000000e-01 : f32
    %122 = vector.broadcast %cst_30 : f32 to vector<8x128xf32>
    %123 = arith.mulf %122, %121 : vector<8x128xf32>
    %124 = math.tanh %123 : vector<8x128xf32>
    %cst_31 = arith.constant 1.000000e+00 : f32
    %125 = vector.broadcast %cst_31 : f32 to vector<8x128xf32>
    %126 = arith.addf %124, %125 : vector<8x128xf32>
    %cst_32 = arith.constant 5.000000e-01 : f32
    %127 = vector.broadcast %cst_32 : f32 to vector<8x128xf32>
    %128 = arith.mulf %127, %126 : vector<8x128xf32>
    %129 = vector.extract_strided_slice %128 {offsets = [0, 0], sizes = [8, 32], strides = [1, 1]} : vector<8x128xf32> to vector<8x32xf32>
    %130 = vector.extract_strided_slice %128 {offsets = [0, 32], sizes = [8, 32], strides = [1, 1]} : vector<8x128xf32> to vector<8x32xf32>
    %131 = vector.extract_strided_slice %128 {offsets = [0, 96], sizes = [8, 32], strides = [1, 1]} : vector<8x128xf32> to vector<8x32xf32>
    %132 = vector.extract_strided_slice %121 {offsets = [0, 64], sizes = [8, 32], strides = [1, 1]} : vector<8x128xf32> to vector<8x32xf32>
    %133 = math.tanh %132 : vector<8x32xf32>
    %134 = arith.mulf %130, %115 : vector<8x32xf32>
    %135 = arith.mulf %129, %133 : vector<8x32xf32>
    %136 = arith.addf %134, %135 : vector<8x32xf32>
    %137 = math.tanh %136 : vector<8x32xf32>
    %138 = arith.mulf %131, %137 : vector<8x32xf32>
    %139 = vector.extract_strided_slice %9 {offsets = [6, 0, 0], sizes = [1, 8, 128], strides = [1, 1, 1]} : vector<10x8x128xf32> to vector<1x8x128xf32>
    %140 = vector.shape_cast %139 : vector<1x8x128xf32> to vector<8x128xf32>
    %cst_33 = arith.constant dense<0.000000e+00> : vector<8x128xf32>
    %141 = tpu.matmul %138, %10, %cst_33 {dimension_numbers = #tpu.dot_dimension_numbers<[1], [0], [0], [1], [0, 0, 1, 1], [], []>} : vector<8x32xf32>, vector<32x128xf32>, vector<8x128xf32> -> vector<8x128xf32>
    %142 = arith.addf %140, %141 : vector<8x128xf32>
    %cst_34 = arith.constant 5.000000e-01 : f32
    %143 = vector.broadcast %cst_34 : f32 to vector<8x128xf32>
    %144 = arith.mulf %143, %142 : vector<8x128xf32>
    %145 = math.tanh %144 : vector<8x128xf32>
    %cst_35 = arith.constant 1.000000e+00 : f32
    %146 = vector.broadcast %cst_35 : f32 to vector<8x128xf32>
    %147 = arith.addf %145, %146 : vector<8x128xf32>
    %cst_36 = arith.constant 5.000000e-01 : f32
    %148 = vector.broadcast %cst_36 : f32 to vector<8x128xf32>
    %149 = arith.mulf %148, %147 : vector<8x128xf32>
    %150 = vector.extract_strided_slice %149 {offsets = [0, 0], sizes = [8, 32], strides = [1, 1]} : vector<8x128xf32> to vector<8x32xf32>
    %151 = vector.extract_strided_slice %149 {offsets = [0, 32], sizes = [8, 32], strides = [1, 1]} : vector<8x128xf32> to vector<8x32xf32>
    %152 = vector.extract_strided_slice %149 {offsets = [0, 96], sizes = [8, 32], strides = [1, 1]} : vector<8x128xf32> to vector<8x32xf32>
    %153 = vector.extract_strided_slice %142 {offsets = [0, 64], sizes = [8, 32], strides = [1, 1]} : vector<8x128xf32> to vector<8x32xf32>
    %154 = math.tanh %153 : vector<8x32xf32>
    %155 = arith.mulf %151, %136 : vector<8x32xf32>
    %156 = arith.mulf %150, %154 : vector<8x32xf32>
    %157 = arith.addf %155, %156 : vector<8x32xf32>
    %158 = math.tanh %157 : vector<8x32xf32>
    %159 = arith.mulf %152, %158 : vector<8x32xf32>
    %160 = vector.extract_strided_slice %9 {offsets = [7, 0, 0], sizes = [1, 8, 128], strides = [1, 1, 1]} : vector<10x8x128xf32> to vector<1x8x128xf32>
    %161 = vector.shape_cast %160 : vector<1x8x128xf32> to vector<8x128xf32>
    %cst_37 = arith.constant dense<0.000000e+00> : vector<8x128xf32>
    %162 = tpu.matmul %159, %10, %cst_37 {dimension_numbers = #tpu.dot_dimension_numbers<[1], [0], [0], [1], [0, 0, 1, 1], [], []>} : vector<8x32xf32>, vector<32x128xf32>, vector<8x128xf32> -> vector<8x128xf32>
    %163 = arith.addf %161, %162 : vector<8x128xf32>
    %cst_38 = arith.constant 5.000000e-01 : f32
    %164 = vector.broadcast %cst_38 : f32 to vector<8x128xf32>
    %165 = arith.mulf %164, %163 : vector<8x128xf32>
    %166 = math.tanh %165 : vector<8x128xf32>
    %cst_39 = arith.constant 1.000000e+00 : f32
    %167 = vector.broadcast %cst_39 : f32 to vector<8x128xf32>
    %168 = arith.addf %166, %167 : vector<8x128xf32>
    %cst_40 = arith.constant 5.000000e-01 : f32
    %169 = vector.broadcast %cst_40 : f32 to vector<8x128xf32>
    %170 = arith.mulf %169, %168 : vector<8x128xf32>
    %171 = vector.extract_strided_slice %170 {offsets = [0, 0], sizes = [8, 32], strides = [1, 1]} : vector<8x128xf32> to vector<8x32xf32>
    %172 = vector.extract_strided_slice %170 {offsets = [0, 32], sizes = [8, 32], strides = [1, 1]} : vector<8x128xf32> to vector<8x32xf32>
    %173 = vector.extract_strided_slice %170 {offsets = [0, 96], sizes = [8, 32], strides = [1, 1]} : vector<8x128xf32> to vector<8x32xf32>
    %174 = vector.extract_strided_slice %163 {offsets = [0, 64], sizes = [8, 32], strides = [1, 1]} : vector<8x128xf32> to vector<8x32xf32>
    %175 = math.tanh %174 : vector<8x32xf32>
    %176 = arith.mulf %172, %157 : vector<8x32xf32>
    %177 = arith.mulf %171, %175 : vector<8x32xf32>
    %178 = arith.addf %176, %177 : vector<8x32xf32>
    %179 = math.tanh %178 : vector<8x32xf32>
    %180 = arith.mulf %173, %179 : vector<8x32xf32>
    %181 = vector.extract_strided_slice %9 {offsets = [8, 0, 0], sizes = [1, 8, 128], strides = [1, 1, 1]} : vector<10x8x128xf32> to vector<1x8x128xf32>
    %182 = vector.shape_cast %181 : vector<1x8x128xf32> to vector<8x128xf32>
    %cst_41 = arith.constant dense<0.000000e+00> : vector<8x128xf32>
    %183 = tpu.matmul %180, %10, %cst_41 {dimension_numbers = #tpu.dot_dimension_numbers<[1], [0], [0], [1], [0, 0, 1, 1], [], []>} : vector<8x32xf32>, vector<32x128xf32>, vector<8x128xf32> -> vector<8x128xf32>
    %184 = arith.addf %182, %183 : vector<8x128xf32>
    %cst_42 = arith.constant 5.000000e-01 : f32
    %185 = vector.broadcast %cst_42 : f32 to vector<8x128xf32>
    %186 = arith.mulf %185, %184 : vector<8x128xf32>
    %187 = math.tanh %186 : vector<8x128xf32>
    %cst_43 = arith.constant 1.000000e+00 : f32
    %188 = vector.broadcast %cst_43 : f32 to vector<8x128xf32>
    %189 = arith.addf %187, %188 : vector<8x128xf32>
    %cst_44 = arith.constant 5.000000e-01 : f32
    %190 = vector.broadcast %cst_44 : f32 to vector<8x128xf32>
    %191 = arith.mulf %190, %189 : vector<8x128xf32>
    %192 = vector.extract_strided_slice %191 {offsets = [0, 0], sizes = [8, 32], strides = [1, 1]} : vector<8x128xf32> to vector<8x32xf32>
    %193 = vector.extract_strided_slice %191 {offsets = [0, 32], sizes = [8, 32], strides = [1, 1]} : vector<8x128xf32> to vector<8x32xf32>
    %194 = vector.extract_strided_slice %191 {offsets = [0, 96], sizes = [8, 32], strides = [1, 1]} : vector<8x128xf32> to vector<8x32xf32>
    %195 = vector.extract_strided_slice %184 {offsets = [0, 64], sizes = [8, 32], strides = [1, 1]} : vector<8x128xf32> to vector<8x32xf32>
    %196 = math.tanh %195 : vector<8x32xf32>
    %197 = arith.mulf %193, %178 : vector<8x32xf32>
    %198 = arith.mulf %192, %196 : vector<8x32xf32>
    %199 = arith.addf %197, %198 : vector<8x32xf32>
    %200 = math.tanh %199 : vector<8x32xf32>
    %201 = arith.mulf %194, %200 : vector<8x32xf32>
    %202 = vector.extract_strided_slice %9 {offsets = [9, 0, 0], sizes = [1, 8, 128], strides = [1, 1, 1]} : vector<10x8x128xf32> to vector<1x8x128xf32>
    %203 = vector.shape_cast %202 : vector<1x8x128xf32> to vector<8x128xf32>
    %cst_45 = arith.constant dense<0.000000e+00> : vector<8x128xf32>
    %204 = tpu.matmul %201, %10, %cst_45 {dimension_numbers = #tpu.dot_dimension_numbers<[1], [0], [0], [1], [0, 0, 1, 1], [], []>} : vector<8x32xf32>, vector<32x128xf32>, vector<8x128xf32> -> vector<8x128xf32>
    %205 = arith.addf %203, %204 : vector<8x128xf32>
    %cst_46 = arith.constant 5.000000e-01 : f32
    %206 = vector.broadcast %cst_46 : f32 to vector<8x128xf32>
    %207 = arith.mulf %206, %205 : vector<8x128xf32>
    %208 = math.tanh %207 : vector<8x128xf32>
    %cst_47 = arith.constant 1.000000e+00 : f32
    %209 = vector.broadcast %cst_47 : f32 to vector<8x128xf32>
    %210 = arith.addf %208, %209 : vector<8x128xf32>
    %cst_48 = arith.constant 5.000000e-01 : f32
    %211 = vector.broadcast %cst_48 : f32 to vector<8x128xf32>
    %212 = arith.mulf %211, %210 : vector<8x128xf32>
    %213 = vector.extract_strided_slice %212 {offsets = [0, 0], sizes = [8, 32], strides = [1, 1]} : vector<8x128xf32> to vector<8x32xf32>
    %214 = vector.extract_strided_slice %212 {offsets = [0, 32], sizes = [8, 32], strides = [1, 1]} : vector<8x128xf32> to vector<8x32xf32>
    %215 = vector.extract_strided_slice %212 {offsets = [0, 96], sizes = [8, 32], strides = [1, 1]} : vector<8x128xf32> to vector<8x32xf32>
    %216 = vector.extract_strided_slice %205 {offsets = [0, 64], sizes = [8, 32], strides = [1, 1]} : vector<8x128xf32> to vector<8x32xf32>
    %217 = math.tanh %216 : vector<8x32xf32>
    %218 = arith.mulf %214, %199 : vector<8x32xf32>
    %219 = arith.mulf %213, %217 : vector<8x32xf32>
    %220 = arith.addf %218, %219 : vector<8x32xf32>
    %221 = math.tanh %220 : vector<8x32xf32>
    %222 = arith.mulf %215, %221 : vector<8x32xf32>
    %c0_49 = arith.constant 0 : index
    %c0_50 = arith.constant 0 : index
    %223 = vector.load %arg4[%c0_49, %c0_50] : memref<32x1xf32, #tpu.memory_space<vmem>>, vector<32x1xf32>
    %cst_51 = arith.constant dense<0.000000e+00> : vector<8x1xf32>
    %224 = tpu.matmul %222, %223, %cst_51 {dimension_numbers = #tpu.dot_dimension_numbers<[1], [0], [0], [1], [0, 0, 1, 1], [], []>} : vector<8x32xf32>, vector<32x1xf32>, vector<8x1xf32> -> vector<8x1xf32>
    %c0_52 = arith.constant 0 : index
    %c0_53 = arith.constant 0 : index
    %225 = vector.load %arg5[%c0_52, %c0_53] : memref<1x1xf32, #tpu.memory_space<vmem>>, vector<1x1xf32>
    %226 = vector.broadcast %225 : vector<1x1xf32> to vector<8x1xf32>
    %227 = arith.addf %224, %226 : vector<8x1xf32>
    %c0_54 = arith.constant 0 : index
    %c0_55 = arith.constant 0 : index
    %228 = vector.load %arg6[%c0_54, %c0_55] : memref<8x1xf32, #tpu.memory_space<vmem>>, vector<8x1xf32>
    tpu.vector_store %arg6[%c0_54, %c0_55], %227 {strides = array<i32>} : memref<8x1xf32, #tpu.memory_space<vmem>>, vector<8x1xf32>,
    return
  }
}

</mosaic_0001>

<bundles_post_ra>
// kernel: tpu_custom_call.1
= control target key start
LH: loop header
LB: loop body
LE: loop exit
PB: predicated region body
PF: predicated region fallthrough
CT: control target
= control target key end

     0   :  { %v1450_v0 = vmov 0.0   ;;  %vm1451_vm0 = vmmov 0   ;;  %v1452_v3 = vmov 0   ;;  %s1453_s10 = smov 64   ;;  %vm123_vm1 = vcmask 261120   ;;  %s1745_s2 = inlined_call_operand.vmem [shape: f32[32,128], index: 2, kind: input, shape index: {}]   ;;  %s1746_s0 = inlined_call_operand.vmem [shape: f32[10,8,1], index: 0, kind: input, shape index: {}]   ;;  %s1747_s1 = inlined_call_operand.vmem [shape: f32[1,128], index: 1, kind: input, shape index: {}]   ;;  %s1748_s3 = inlined_call_operand.vmem [shape: f32[1,128], index: 3, kind: input, shape index: {}]   ;;  %s1749_s4 = inlined_call_operand.vmem [shape: f32[32,1], index: 4, kind: input, shape index: {}]   ;;  %s1750_s5 = inlined_call_operand.<no memory space> [shape: f32[1,1], index: 5, kind: input, shape index: {}]   ;;  %s1751_s6 = inlined_call_operand.vmem [shape: f32[8,1], index: 6, kind: output, shape index: {}]  }
   0x1   :  { %1262 = vmatprep.subr.mxu0 %v1450_v0  ;;  %v1494_v1 = vld [vmem:[%s1745_s2 + $0x18] sm:$0xff]  ;;  %v1499_v2 = vld [vmem:[%s1745_s2 + $0x10] sm:$0xff]  ;;  %1270 = vmatprep.mubr.msk.f32.mxu0 %vm1451_vm0, %v1450_v0  ;;  %v25_v4 = vld [vmem:[%s1746_s0] sm:$0xff]  ;;  %vm1188_vm2 = vcmask 7168  }
   0x2   :  { %1263 = vmatpush3.msra.mxu0 %v1494_v1  ;;  %1388 = vset.pattern.permute.xlu0 %v1452_v3  ;;  %v1511_v5 = vld [vmem:[%s1745_s2 + $0x8] sm:$0xff]  ;;  %v1519_v6 = vld [vmem:[%s1745_s2] sm:$0xff]  ;;  %v27_v47 = vld [vmem:[%s1746_s0 + $0x10] sm:$0xff] }
   0x3   :  { %1264 = vmatprep.subr.mxu0 %v1450_v0  ;;  %38 = vperm.xlu0 %1388, %v25_v4   ;;  %v1549_v7 = vld [vmem:[%s1747_s1] ss:$0 sm:$0xff]  ;;  %s1454_s1 = smov 32   ;;  %v26_v26 = vld [vmem:[%s1746_s0 + $0x8] sm:$0xff] }
   0x4   :  { %1265 = vmatpush3.msra.mxu0 %v1499_v2  ;;  %1273 = vmatprep.subr.mxu1 %v1450_v0  ;;  %v1555_v10 = vld [vmem:[%s1748_s3] ss:$0 sm:$0xff] }
   0x5   :  { %1266 = vmatprep.subr.mxu0 %v1450_v0  ;;  %1274 = vmatpush3.msra.mxu1 %v1494_v1 }
   0x6   :  { %1267 = vmatpush3.msra.mxu0 %v1511_v5  ;;  %1275 = vmatprep.subr.mxu1 %v1450_v0 }
   0x7   :  { %1268 = vmatprep.subr.mxu0 %v1450_v0  ;;  %1276 = vmatpush3.msra.mxu1 %v1499_v2 }
   0x8   :  { %1269 = vmatpush3.msra.mxu0 %v1519_v6  ;;  %1277 = vmatprep.subr.mxu1 %v1450_v0 }
   0x9   :  { %1271 = vmatmul.mubr.f32.vlgmr.msra.gmra.mxu0 %v1450_v0  ;;  %1278 = vmatpush3.msra.mxu1 %v1511_v5 }
   0xa   :  { %1279 = vmatprep.subr.mxu1 %v1450_v0  ;;  %1281 = vmatprep.mubr.msk.f32.mxu1 %vm1451_vm0, %v1450_v0 }
   0xb   :  { %1280 = vmatpush3.msra.mxu1 %v1519_v6  ;;  %1389 = vset.pattern.permute.xlu1 %v1452_v3 }
   0xc   :  { %1284 = vmatprep.subr.mxu0 %v1450_v0  ;;  %1292 = vmatprep.mubr.msk.f32.mxu0 %vm1451_vm0, %v1450_v0 }
   0xd   :  { %1285 = vmatpush3.msra.mxu0 %v1494_v1  ;;  %1295 = vmatprep.subr.mxu1 %v1450_v0 }
   0xe   :  { %1286 = vmatprep.subr.mxu0 %v1450_v0 }
   0xf   :  { %1287 = vmatpush3.msra.mxu0 %v1499_v2 }
  0x10   :  { %1288 = vmatprep.subr.mxu0 %v1450_v0 }
  0x11   :  { %1289 = vmatpush3.msra.mxu0 %v1511_v5 }
  0x12   :  { %1290 = vmatprep.subr.mxu0 %v1450_v0 }
  0x13   :  { %1291 = vmatpush3.msra.mxu0 %v1519_v6 }
  0x14   :  { %1306 = vmatprep.subr.mxu0 %v1450_v0 }
  0x7e   :  { %v39_v8 = vpop.permute.xlu0 %38 }
  0x7f   :  { %v92_v9 = vmul.f32 %v1549_v7, %v39_v8 }
  0x81   :  { %v109_v11 = vadd.f32 %v1555_v10, %v92_v9 }
  0xc9   :  { %v193_v12 = vpop.f32.mrf.mxu0 }
  0xca   :  { %v197_v13 = vadd.f32 %v193_v12, %v109_v11  ;;  %v28_v11 = vld [vmem:[%s1746_s0 + $0x18] sm:$0xff] }
  0xcb   :  { %v1272_v14 = vpop.f32.mrf.mxu0 }
  0xcc   :  { %1390 = vtanh.f32 %v197_v13  ;;  %v198_v16 = vmul.f32 0.5, %v197_v13 }
  0xce   :  { %1392 = vtanh.f32 %v198_v16 }
  0xd9   :  { %v1391_v15 = vpop.eup %1390 }
  0xda   :  { %205 = vrot.lane.b32.xlu0 %v1391_v15, %s1453_s10 }
  0xdb   :  { %v1393_v17 = vpop.eup %1392 }
  0xdc   :  { %v200_v18 = vadd.f32 1.0, %v1393_v17 }
  0xde   :  { %v201_v19 = vmul.f32 0.5, %v200_v18 }
  0xe0   :  { %v203_v22 = vmul.f32 0.0, %v201_v19 }
 0x14c   :  { %v206_v20 = vpop.permute.xlu0 %205 }
 0x14d   :  { %v208_v21 = vmul.f32 %v206_v20, %v201_v19 }
 0x14f   :  { %210 = vrot.lane.b32.xlu1 %v208_v21, %s1454_s1 }
 0x1c1   :  { %v211_v23 = vpop.permute.xlu1 %210 }
 0x1c2   :  { %v213_v24 = vadd.f32 %v211_v23, %v203_v22 }
 0x1c4   :  { %1394 = vtanh.f32 %v213_v24 }
 0x1d1   :  { %v1395_v25 = vpop.eup %1394 }
 0x1d2   :  { %216 = vrot.lane.b32.xlu1 %v1395_v25, %s1453_s10 }
 0x1d6   :  { %43 = vperm.xlu1 %1389, %v26_v26  }
 0x244   :  { %v217_v27 = vpop.permute.xlu1 %216 }
 0x245   :  { %v219_v28 = vmul.f32 %v217_v27, %v201_v19 }
 0x247   :  { %221 = vrot.lane.b32.xlu0 %v219_v28, %s1454_s1 }
 0x251   :  { %v44_v30 = vpop.permute.xlu1 %43 }
 0x252   :  { %v93_v31 = vmul.f32 %v1549_v7, %v44_v30 }
 0x254   :  { %v110_v32 = vadd.f32 %v1555_v10, %v93_v31 }
 0x2b9   :  { %v222_v29 = vpop.permute.xlu0 %221 }
 0x2ba   :  { %1282 = vmatmul.mubr.msk.f32.vlgmr.msra.gmra.mxu1 %vm123_vm1, %v222_v29 }
 0x2bb   :  { %1296 = vmatpush3.msra.mxu1 %v1494_v1  ;;  %1303 = vmatprep.mubr.msk.f32.mxu1 %vm1451_vm0, %v1450_v0 }
 0x2bc   :  { %1297 = vmatprep.subr.mxu1 %v1450_v0 }
 0x2bd   :  { %1298 = vmatpush3.msra.mxu1 %v1499_v2 }
 0x2be   :  { %1299 = vmatprep.subr.mxu1 %v1450_v0 }
 0x2bf   :  { %1300 = vmatpush3.msra.mxu1 %v1511_v5 }
 0x2c0   :  { %1301 = vmatprep.subr.mxu1 %v1450_v0 }
 0x2c1   :  { %1302 = vmatpush3.msra.mxu1 %v1519_v6 }
 0x2c2   :  { %1317 = vmatprep.subr.mxu1 %v1450_v0 }
 0x37a   :  { %v291_v33 = vpop.f32.mrf.mxu1 }
 0x37b   :  { %v295_v34 = vadd.f32 %v291_v33, %v110_v32  ;;  %v29_v32 = vld [vmem:[%s1746_s0 + $0x20] sm:$0xff] }
 0x37c   :  { %v1283_v35 = vpop.f32.mrf.mxu1 }
 0x37d   :  { %1396 = vtanh.f32 %v295_v34  ;;  %v296_v37 = vmul.f32 0.5, %v295_v34 }
 0x37f   :  { %1398 = vtanh.f32 %v296_v37 }
 0x38a   :  { %v1397_v36 = vpop.eup %1396 }
 0x38b   :  { %303 = vrot.lane.b32.xlu0 %v1397_v36, %s1453_s10 }
 0x38c   :  { %v1399_v38 = vpop.eup %1398 }
 0x38d   :  { %v298_v39 = vadd.f32 1.0, %v1399_v38 }
 0x38f   :  { %v299_v40 = vmul.f32 0.5, %v298_v39 }
 0x391   :  { %v301_v43 = vmul.f32 %v299_v40, %v213_v24 }
 0x3fd   :  { %v304_v41 = vpop.permute.xlu0 %303 }
 0x3fe   :  { %v306_v42 = vmul.f32 %v304_v41, %v299_v40 }
 0x400   :  { %308 = vrot.lane.b32.xlu1 %v306_v42, %s1454_s1 }
 0x472   :  { %v309_v44 = vpop.permute.xlu1 %308 }
 0x473   :  { %v311_v45 = vadd.f32 %v309_v44, %v301_v43 }
 0x475   :  { %1400 = vtanh.f32 %v311_v45 }
 0x482   :  { %v1401_v46 = vpop.eup %1400 }
 0x483   :  { %314 = vrot.lane.b32.xlu0 %v1401_v46, %s1453_s10 }
 0x487   :  { %48 = vperm.xlu0 %1388, %v27_v47  }
 0x4f5   :  { %v315_v48 = vpop.permute.xlu0 %314 }
 0x4f6   :  { %v317_v49 = vmul.f32 %v315_v48, %v299_v40 }
 0x4f8   :  { %319 = vrot.lane.b32.xlu1 %v317_v49, %s1454_s1 }
 0x502   :  { %v49_v51 = vpop.permute.xlu0 %48 }
 0x503   :  { %v94_v52 = vmul.f32 %v1549_v7, %v49_v51 }
 0x505   :  { %v111_v53 = vadd.f32 %v1555_v10, %v94_v52 }
 0x56a   :  { %v320_v50 = vpop.permute.xlu1 %319 }
 0x56b   :  { %1293 = vmatmul.mubr.msk.f32.vlgmr.msra.gmra.mxu0 %vm123_vm1, %v320_v50 }
 0x56c   :  { %1307 = vmatpush3.msra.mxu0 %v1494_v1  ;;  %1314 = vmatprep.mubr.msk.f32.mxu0 %vm1451_vm0, %v1450_v0 }
 0x56d   :  { %1308 = vmatprep.subr.mxu0 %v1450_v0 }
 0x56e   :  { %1309 = vmatpush3.msra.mxu0 %v1499_v2 }
 0x56f   :  { %1310 = vmatprep.subr.mxu0 %v1450_v0 }
 0x570   :  { %1311 = vmatpush3.msra.mxu0 %v1511_v5 }
 0x571   :  { %1312 = vmatprep.subr.mxu0 %v1450_v0 }
 0x572   :  { %1313 = vmatpush3.msra.mxu0 %v1519_v6 }
 0x573   :  { %1328 = vmatprep.subr.mxu0 %v1450_v0 }
 0x62b   :  { %v389_v54 = vpop.f32.mrf.mxu0 }
 0x62c   :  { %v393_v55 = vadd.f32 %v389_v54, %v111_v53  ;;  %v30_v53 = vld [vmem:[%s1746_s0 + $0x28] sm:$0xff] }
 0x62d   :  { %v1294_v56 = vpop.f32.mrf.mxu0 }
 0x62e   :  { %1402 = vtanh.f32 %v393_v55  ;;  %v394_v58 = vmul.f32 0.5, %v393_v55 }
 0x630   :  { %1404 = vtanh.f32 %v394_v58 }
 0x63b   :  { %v1403_v57 = vpop.eup %1402 }
 0x63c   :  { %401 = vrot.lane.b32.xlu1 %v1403_v57, %s1453_s10 }
 0x63d   :  { %v1405_v59 = vpop.eup %1404 }
 0x63e   :  { %v396_v60 = vadd.f32 1.0, %v1405_v59 }
 0x640   :  { %v397_v61 = vmul.f32 0.5, %v396_v60 }
 0x642   :  { %v399_v3 = vmul.f32 %v397_v61, %v311_v45 }
 0x6ae   :  { %v402_v62 = vpop.permute.xlu1 %401 }
 0x6af   :  { %v404_v63 = vmul.f32 %v402_v62, %v397_v61 }
 0x6b1   :  { %406 = vrot.lane.b32.xlu0 %v404_v63, %s1454_s1 }
 0x723   :  { %v407_v4 = vpop.permute.xlu0 %406 }
 0x724   :  { %v409_v8 = vadd.f32 %v407_v4, %v399_v3 }
 0x726   :  { %1406 = vtanh.f32 %v409_v8 }
 0x733   :  { %v1407_v9 = vpop.eup %1406 }
 0x734   :  { %412 = vrot.lane.b32.xlu1 %v1407_v9, %s1453_s10 }
 0x738   :  { %53 = vperm.xlu1 %1389, %v28_v11  }
 0x7a6   :  { %v413_v12 = vpop.permute.xlu1 %412 }
 0x7a7   :  { %v415_v13 = vmul.f32 %v413_v12, %v397_v61 }
 0x7a9   :  { %417 = vrot.lane.b32.xlu0 %v415_v13, %s1454_s1 }
 0x7b3   :  { %v54_v15 = vpop.permute.xlu1 %53 }
 0x7b4   :  { %v95_v16 = vmul.f32 %v1549_v7, %v54_v15 }
 0x7b6   :  { %v112_v17 = vadd.f32 %v1555_v10, %v95_v16 }
 0x81b   :  { %v418_v14 = vpop.permute.xlu0 %417 }
 0x81c   :  { %1304 = vmatmul.mubr.msk.f32.vlgmr.msra.gmra.mxu1 %vm123_vm1, %v418_v14 }
 0x81d   :  { %1318 = vmatpush3.msra.mxu1 %v1494_v1  ;;  %1325 = vmatprep.mubr.msk.f32.mxu1 %vm1451_vm0, %v1450_v0 }
 0x81e   :  { %1319 = vmatprep.subr.mxu1 %v1450_v0 }
 0x81f   :  { %1320 = vmatpush3.msra.mxu1 %v1499_v2 }
 0x820   :  { %1321 = vmatprep.subr.mxu1 %v1450_v0 }
 0x821   :  { %1322 = vmatpush3.msra.mxu1 %v1511_v5 }
 0x822   :  { %1323 = vmatprep.subr.mxu1 %v1450_v0 }
 0x823   :  { %1324 = vmatpush3.msra.mxu1 %v1519_v6 }
 0x824   :  { %1339 = vmatprep.subr.mxu1 %v1450_v0 }
 0x8dc   :  { %v487_v18 = vpop.f32.mrf.mxu1 }
 0x8dd   :  { %v491_v19 = vadd.f32 %v487_v18, %v112_v17  ;;  %v31_v17 = vld [vmem:[%s1746_s0 + $0x30] sm:$0xff] }
 0x8de   :  { %v1305_v20 = vpop.f32.mrf.mxu1 }
 0x8df   :  { %1408 = vtanh.f32 %v491_v19  ;;  %v492_v22 = vmul.f32 0.5, %v491_v19 }
 0x8e1   :  { %1410 = vtanh.f32 %v492_v22 }
 0x8ec   :  { %v1409_v21 = vpop.eup %1408 }
 0x8ed   :  { %499 = vrot.lane.b32.xlu0 %v1409_v21, %s1453_s10 }
 0x8ee   :  { %v1411_v23 = vpop.eup %1410 }
 0x8ef   :  { %v494_v24 = vadd.f32 1.0, %v1411_v23 }
 0x8f1   :  { %v495_v25 = vmul.f32 0.5, %v494_v24 }
 0x8f3   :  { %v497_v28 = vmul.f32 %v495_v25, %v409_v8 }
 0x95f   :  { %v500_v26 = vpop.permute.xlu0 %499 }
 0x960   :  { %v502_v27 = vmul.f32 %v500_v26, %v495_v25 }
 0x962   :  { %504 = vrot.lane.b32.xlu1 %v502_v27, %s1454_s1 }
 0x9d4   :  { %v505_v29 = vpop.permute.xlu1 %504 }
 0x9d5   :  { %v507_v30 = vadd.f32 %v505_v29, %v497_v28 }
 0x9d7   :  { %1412 = vtanh.f32 %v507_v30 }
 0x9e4   :  { %v1413_v31 = vpop.eup %1412 }
 0x9e5   :  { %510 = vrot.lane.b32.xlu0 %v1413_v31, %s1453_s10 }
 0x9e9   :  { %58 = vperm.xlu0 %1388, %v29_v32  }
 0xa57   :  { %v511_v33 = vpop.permute.xlu0 %510 }
 0xa58   :  { %v513_v34 = vmul.f32 %v511_v33, %v495_v25 }
 0xa5a   :  { %515 = vrot.lane.b32.xlu1 %v513_v34, %s1454_s1 }
 0xa64   :  { %v59_v36 = vpop.permute.xlu0 %58 }
 0xa65   :  { %v96_v37 = vmul.f32 %v1549_v7, %v59_v36 }
 0xa67   :  { %v113_v38 = vadd.f32 %v1555_v10, %v96_v37 }
 0xacc   :  { %v516_v35 = vpop.permute.xlu1 %515 }
 0xacd   :  { %1315 = vmatmul.mubr.msk.f32.vlgmr.msra.gmra.mxu0 %vm123_vm1, %v516_v35 }
 0xace   :  { %1329 = vmatpush3.msra.mxu0 %v1494_v1  ;;  %1336 = vmatprep.mubr.msk.f32.mxu0 %vm1451_vm0, %v1450_v0 }
 0xacf   :  { %1330 = vmatprep.subr.mxu0 %v1450_v0 }
 0xad0   :  { %1331 = vmatpush3.msra.mxu0 %v1499_v2 }
 0xad1   :  { %1332 = vmatprep.subr.mxu0 %v1450_v0 }
 0xad2   :  { %1333 = vmatpush3.msra.mxu0 %v1511_v5 }
 0xad3   :  { %1334 = vmatprep.subr.mxu0 %v1450_v0 }
 0xad4   :  { %1335 = vmatpush3.msra.mxu0 %v1519_v6 }
 0xad5   :  { %1350 = vmatprep.subr.mxu0 %v1450_v0 }
 0xb8d   :  { %v585_v39 = vpop.f32.mrf.mxu0 }
 0xb8e   :  { %v589_v40 = vadd.f32 %v585_v39, %v113_v38  ;;  %v32_v38 = vld [vmem:[%s1746_s0 + $0x38] sm:$0xff] }
 0xb8f   :  { %v1316_v41 = vpop.f32.mrf.mxu0 }
 0xb90   :  { %1414 = vtanh.f32 %v589_v40  ;;  %v590_v43 = vmul.f32 0.5, %v589_v40 }
 0xb92   :  { %1416 = vtanh.f32 %v590_v43 }
 0xb9d   :  { %v1415_v42 = vpop.eup %1414 }
 0xb9e   :  { %597 = vrot.lane.b32.xlu1 %v1415_v42, %s1453_s10 }
 0xb9f   :  { %v1417_v44 = vpop.eup %1416 }
 0xba0   :  { %v592_v45 = vadd.f32 1.0, %v1417_v44 }
 0xba2   :  { %v593_v46 = vmul.f32 0.5, %v592_v45 }
 0xba4   :  { %v595_v49 = vmul.f32 %v593_v46, %v507_v30 }
 0xc10   :  { %v598_v47 = vpop.permute.xlu1 %597 }
 0xc11   :  { %v600_v48 = vmul.f32 %v598_v47, %v593_v46 }
 0xc13   :  { %602 = vrot.lane.b32.xlu0 %v600_v48, %s1454_s1 }
 0xc85   :  { %v603_v50 = vpop.permute.xlu0 %602 }
 0xc86   :  { %v605_v51 = vadd.f32 %v603_v50, %v595_v49 }
 0xc88   :  { %1418 = vtanh.f32 %v605_v51 }
 0xc95   :  { %v1419_v52 = vpop.eup %1418 }
 0xc96   :  { %608 = vrot.lane.b32.xlu1 %v1419_v52, %s1453_s10 }
 0xc9a   :  { %63 = vperm.xlu1 %1389, %v30_v53  }
 0xd08   :  { %v609_v54 = vpop.permute.xlu1 %608 }
 0xd09   :  { %v611_v55 = vmul.f32 %v609_v54, %v593_v46 }
 0xd0b   :  { %613 = vrot.lane.b32.xlu0 %v611_v55, %s1454_s1  ;;  %v33_v55 = vld [vmem:[%s1746_s0 + $0x40] sm:$0xff] }
 0xd15   :  { %v64_v57 = vpop.permute.xlu1 %63 }
 0xd16   :  { %v97_v58 = vmul.f32 %v1549_v7, %v64_v57 }
 0xd18   :  { %v114_v59 = vadd.f32 %v1555_v10, %v97_v58 }
 0xd7d   :  { %v614_v56 = vpop.permute.xlu0 %613 }
 0xd7e   :  { %1326 = vmatmul.mubr.msk.f32.vlgmr.msra.gmra.mxu1 %vm123_vm1, %v614_v56 }
 0xd7f   :  { %1340 = vmatpush3.msra.mxu1 %v1494_v1  ;;  %1347 = vmatprep.mubr.msk.f32.mxu1 %vm1451_vm0, %v1450_v0 }
 0xd80   :  { %1341 = vmatprep.subr.mxu1 %v1450_v0 }
 0xd81   :  { %1342 = vmatpush3.msra.mxu1 %v1499_v2 }
 0xd82   :  { %1343 = vmatprep.subr.mxu1 %v1450_v0 }
 0xd83   :  { %1344 = vmatpush3.msra.mxu1 %v1511_v5 }
 0xd84   :  { %1345 = vmatprep.subr.mxu1 %v1450_v0 }
 0xd85   :  { %1346 = vmatpush3.msra.mxu1 %v1519_v6 }
 0xd86   :  { %1361 = vmatprep.subr.mxu1 %v1450_v0 }
 0xe3e   :  { %v683_v60 = vpop.f32.mrf.mxu1 }
 0xe3f   :  { %v687_v61 = vadd.f32 %v683_v60, %v114_v59 }
 0xe40   :  { %v1327_v62 = vpop.f32.mrf.mxu1 }
 0xe41   :  { %1420 = vtanh.f32 %v687_v61  ;;  %v688_v3 = vmul.f32 0.5, %v687_v61 }
 0xe43   :  { %1422 = vtanh.f32 %v688_v3 }
 0xe4e   :  { %v1421_v63 = vpop.eup %1420 }
 0xe4f   :  { %695 = vrot.lane.b32.xlu0 %v1421_v63, %s1453_s10 }
 0xe50   :  { %v1423_v4 = vpop.eup %1422 }
 0xe51   :  { %v690_v8 = vadd.f32 1.0, %v1423_v4 }
 0xe53   :  { %v691_v9 = vmul.f32 0.5, %v690_v8 }
 0xe55   :  { %v693_v13 = vmul.f32 %v691_v9, %v605_v51 }
 0xec1   :  { %v696_v11 = vpop.permute.xlu0 %695 }
 0xec2   :  { %v698_v12 = vmul.f32 %v696_v11, %v691_v9 }
 0xec4   :  { %700 = vrot.lane.b32.xlu1 %v698_v12, %s1454_s1 }
 0xf36   :  { %v701_v14 = vpop.permute.xlu1 %700 }
 0xf37   :  { %v703_v15 = vadd.f32 %v701_v14, %v693_v13 }
 0xf39   :  { %1424 = vtanh.f32 %v703_v15 }
 0xf46   :  { %v1425_v16 = vpop.eup %1424 }
 0xf47   :  { %706 = vrot.lane.b32.xlu0 %v1425_v16, %s1453_s10 }
 0xf4b   :  { %68 = vperm.xlu0 %1388, %v31_v17  }
 0xfb9   :  { %v707_v18 = vpop.permute.xlu0 %706 }
 0xfba   :  { %v709_v19 = vmul.f32 %v707_v18, %v691_v9 }
 0xfbc   :  { %711 = vrot.lane.b32.xlu1 %v709_v19, %s1454_s1  ;;  %v34_v19 = vld [vmem:[%s1746_s0 + $0x48] sm:$0xff] }
 0xfc6   :  { %v69_v21 = vpop.permute.xlu0 %68 }
 0xfc7   :  { %v98_v22 = vmul.f32 %v1549_v7, %v69_v21 }
 0xfc9   :  { %v115_v23 = vadd.f32 %v1555_v10, %v98_v22 }
0x102e   :  { %v712_v20 = vpop.permute.xlu1 %711 }
0x102f   :  { %1337 = vmatmul.mubr.msk.f32.vlgmr.msra.gmra.mxu0 %vm123_vm1, %v712_v20 }
0x1030   :  { %1351 = vmatpush3.msra.mxu0 %v1494_v1  ;;  %1358 = vmatprep.mubr.msk.f32.mxu0 %vm1451_vm0, %v1450_v0 }
0x1031   :  { %1352 = vmatprep.subr.mxu0 %v1450_v0 }
0x1032   :  { %1353 = vmatpush3.msra.mxu0 %v1499_v2 }
0x1033   :  { %1354 = vmatprep.subr.mxu0 %v1450_v0 }
0x1034   :  { %1355 = vmatpush3.msra.mxu0 %v1511_v5 }
0x1035   :  { %1356 = vmatprep.subr.mxu0 %v1450_v0 }
0x1036   :  { %1357 = vmatpush3.msra.mxu0 %v1519_v6 }
0x1037   :  { %1372 = vmatprep.subr.mxu0 %v1450_v0 }
0x10ef   :  { %v781_v24 = vpop.f32.mrf.mxu0 }
0x10f0   :  { %v785_v25 = vadd.f32 %v781_v24, %v115_v23 }
0x10f1   :  { %v1338_v26 = vpop.f32.mrf.mxu0 }
0x10f2   :  { %1426 = vtanh.f32 %v785_v25  ;;  %v786_v28 = vmul.f32 0.5, %v785_v25 }
0x10f4   :  { %1428 = vtanh.f32 %v786_v28 }
0x10ff   :  { %v1427_v27 = vpop.eup %1426 }
0x1100   :  { %793 = vrot.lane.b32.xlu1 %v1427_v27, %s1453_s10 }
0x1101   :  { %v1429_v29 = vpop.eup %1428 }
0x1102   :  { %v788_v30 = vadd.f32 1.0, %v1429_v29 }
0x1104   :  { %v789_v31 = vmul.f32 0.5, %v788_v30 }
0x1106   :  { %v791_v34 = vmul.f32 %v789_v31, %v703_v15 }
0x1172   :  { %v794_v32 = vpop.permute.xlu1 %793 }
0x1173   :  { %v796_v33 = vmul.f32 %v794_v32, %v789_v31 }
0x1175   :  { %798 = vrot.lane.b32.xlu0 %v796_v33, %s1454_s1 }
0x11e7   :  { %v799_v35 = vpop.permute.xlu0 %798 }
0x11e8   :  { %v801_v36 = vadd.f32 %v799_v35, %v791_v34 }
0x11ea   :  { %1430 = vtanh.f32 %v801_v36 }
0x11f7   :  { %v1431_v37 = vpop.eup %1430 }
0x11f8   :  { %804 = vrot.lane.b32.xlu1 %v1431_v37, %s1453_s10 }
0x11fc   :  { %73 = vperm.xlu1 %1389, %v32_v38   ;;  %v1104_v38 = vld [vmem:[%s1749_s4 + $0x10] sm:$0xff] }
0x126a   :  { %v805_v39 = vpop.permute.xlu1 %804 }
0x126b   :  { %v807_v40 = vmul.f32 %v805_v39, %v789_v31  ;;  %v1103_v39 = vld [vmem:[%s1749_s4 + $0x8] sm:$0xff] }
0x126d   :  { %809 = vrot.lane.b32.xlu0 %v807_v40, %s1454_s1  ;;  %v1102_v40 = vld [vmem:[%s1749_s4] sm:$0xff] }
0x1277   :  { %v74_v42 = vpop.permute.xlu1 %73 }
0x1278   :  { %v99_v43 = vmul.f32 %v1549_v7, %v74_v42  ;;  %v11_v42 = vstv %s1750_s5 }
0x1279   :  { %12 = vst [vmem:[#allocation2] sm:$0x1] %v11_v42 }
0x12df   :  { %v810_v41 = vpop.permute.xlu0 %809 }
0x12e0   :  { %1348 = vmatmul.mubr.msk.f32.vlgmr.msra.gmra.mxu1 %vm123_vm1, %v810_v41 }
0x12e1   :  { %1362 = vmatpush3.msra.mxu1 %v1494_v1  ;;  %1369 = vmatprep.mubr.msk.f32.mxu1 %vm1451_vm0, %v1450_v0  ;;  %v116_v1 = vadd.f32 %v1555_v10, %v99_v43 }
0x12e2   :  { %1363 = vmatprep.subr.mxu1 %v1450_v0 }
0x12e3   :  { %1364 = vmatpush3.msra.mxu1 %v1499_v2 }
0x12e4   :  { %1365 = vmatprep.subr.mxu1 %v1450_v0 }
0x12e5   :  { %1366 = vmatpush3.msra.mxu1 %v1511_v5 }
0x12e6   :  { %1367 = vmatprep.subr.mxu1 %v1450_v0 }
0x12e7   :  { %1368 = vmatpush3.msra.mxu1 %v1519_v6 }
0x13a0   :  { %v879_v44 = vpop.f32.mrf.mxu1 }
0x13a1   :  { %v883_v45 = vadd.f32 %v879_v44, %v116_v1 }
0x13a2   :  { %v1349_v46 = vpop.f32.mrf.mxu1 }
0x13a3   :  { %1432 = vtanh.f32 %v883_v45  ;;  %v884_v2 = vmul.f32 0.5, %v883_v45  ;;  %v1205_v45 = vld [vmem:[#allocation2] ss:$0 sm:$0xff] }
0x13a5   :  { %1434 = vtanh.f32 %v884_v2 }
0x13b0   :  { %v1433_v47 = vpop.eup %1432 }
0x13b1   :  { %891 = vrot.lane.b32.xlu0 %v1433_v47, %s1453_s10 }
0x13b2   :  { %v1435_v48 = vpop.eup %1434 }
0x13b3   :  { %v886_v5 = vadd.f32 1.0, %v1435_v48 }
0x13b5   :  { %v887_v49 = vmul.f32 0.5, %v886_v5 }
0x13b7   :  { %v889_v6 = vmul.f32 %v887_v49, %v801_v36 }
0x1423   :  { %v892_v50 = vpop.permute.xlu0 %891 }
0x1424   :  { %v894_v51 = vmul.f32 %v892_v50, %v887_v49 }
0x1426   :  { %896 = vrot.lane.b32.xlu1 %v894_v51, %s1454_s1 }
0x1498   :  { %v897_v52 = vpop.permute.xlu1 %896 }
0x1499   :  { %v899_v53 = vadd.f32 %v897_v52, %v889_v6 }
0x149b   :  { %1436 = vtanh.f32 %v899_v53 }
0x14a8   :  { %v1437_v54 = vpop.eup %1436 }
0x14a9   :  { %902 = vrot.lane.b32.xlu0 %v1437_v54, %s1453_s10 }
0x14ad   :  { %78 = vperm.xlu0 %1388, %v33_v55  }
0x151b   :  { %v903_v56 = vpop.permute.xlu0 %902 }
0x151c   :  { %v905_v57 = vmul.f32 %v903_v56, %v887_v49 }
0x151e   :  { %907 = vrot.lane.b32.xlu1 %v905_v57, %s1454_s1 }
0x1528   :  { %v79_v59 = vpop.permute.xlu0 %78 }
0x1529   :  { %v100_v60 = vmul.f32 %v1549_v7, %v79_v59 }
0x152b   :  { %v117_v61 = vadd.f32 %v1555_v10, %v100_v60 }
0x1590   :  { %v908_v58 = vpop.permute.xlu1 %907 }
0x1591   :  { %1359 = vmatmul.mubr.msk.f32.vlgmr.msra.gmra.mxu0 %vm123_vm1, %v908_v58 }
0x1592   :  { %1380 = vmatprep.mubr.msk.f32.mxu0 %vm1451_vm0, %v1450_v0 }
0x1651   :  { %v977_v62 = vpop.f32.mrf.mxu0 }
0x1652   :  { %v981_v63 = vadd.f32 %v977_v62, %v117_v61 }
0x1653   :  { %v1360_v3 = vpop.f32.mrf.mxu0 }
0x1654   :  { %1438 = vtanh.f32 %v981_v63  ;;  %v982_v8 = vmul.f32 0.5, %v981_v63 }
0x1656   :  { %1440 = vtanh.f32 %v982_v8 }
0x1661   :  { %v1439_v4 = vpop.eup %1438 }
0x1662   :  { %989 = vrot.lane.b32.xlu1 %v1439_v4, %s1453_s10 }
0x1663   :  { %v1441_v9 = vpop.eup %1440 }
0x1664   :  { %v984_v11 = vadd.f32 1.0, %v1441_v9 }
0x1666   :  { %v985_v12 = vmul.f32 0.5, %v984_v11 }
0x1668   :  { %v987_v15 = vmul.f32 %v985_v12, %v899_v53 }
0x16d4   :  { %v990_v13 = vpop.permute.xlu1 %989 }
0x16d5   :  { %v992_v14 = vmul.f32 %v990_v13, %v985_v12 }
0x16d7   :  { %994 = vrot.lane.b32.xlu0 %v992_v14, %s1454_s1 }
0x1749   :  { %v995_v16 = vpop.permute.xlu0 %994 }
0x174a   :  { %v997_v17 = vadd.f32 %v995_v16, %v987_v15 }
0x174c   :  { %1442 = vtanh.f32 %v997_v17 }
0x1759   :  { %v1443_v18 = vpop.eup %1442 }
0x175a   :  { %1000 = vrot.lane.b32.xlu1 %v1443_v18, %s1453_s10 }
0x175e   :  { %83 = vperm.xlu1 %1389, %v34_v19  }
0x17cc   :  { %v1001_v20 = vpop.permute.xlu1 %1000 }
0x17cd   :  { %v1003_v21 = vmul.f32 %v1001_v20, %v985_v12 }
0x17cf   :  { %1005 = vrot.lane.b32.xlu0 %v1003_v21, %s1454_s1 }
0x17d9   :  { %v84_v23 = vpop.permute.xlu1 %83 }
0x17da   :  { %v101_v24 = vmul.f32 %v1549_v7, %v84_v23 }
0x17dc   :  { %v118_v25 = vadd.f32 %v1555_v10, %v101_v24  ;;  %v1105_v10 = vld [vmem:[%s1749_s4 + $0x18] sm:$0xff] }
0x17dd   :  { %1373 = vmatpush3.msra.mxu0 %v1105_v10 }
0x17de   :  { %1374 = vmatprep.subr.mxu0 %v1450_v0 }
0x17df   :  { %1375 = vmatpush3.msra.mxu0 %v1104_v38 }
0x17e0   :  { %1376 = vmatprep.subr.mxu0 %v1450_v0 }
0x17e1   :  { %1377 = vmatpush3.msra.mxu0 %v1103_v39 }
0x17e2   :  { %1378 = vmatprep.subr.mxu0 %v1450_v0 }
0x17e3   :  { %1379 = vmatpush3.msra.mxu0 %v1102_v40 }
0x1841   :  { %v1006_v22 = vpop.permute.xlu0 %1005 }
0x1842   :  { %1370 = vmatmul.mubr.msk.f32.vlgmr.msra.gmra.mxu1 %vm123_vm1, %v1006_v22 }
0x1902   :  { %v1075_v26 = vpop.f32.mrf.mxu1 }
0x1903   :  { %v1079_v27 = vadd.f32 %v1075_v26, %v118_v25 }
0x1904   :  { %v1371_v28 = vpop.f32.mrf.mxu1 }
0x1905   :  { %1444 = vtanh.f32 %v1079_v27  ;;  %v1080_v30 = vmul.f32 0.5, %v1079_v27 }
0x1907   :  { %1446 = vtanh.f32 %v1080_v30 }
0x1912   :  { %v1445_v29 = vpop.eup %1444 }
0x1913   :  { %1087 = vrot.lane.b32.xlu0 %v1445_v29, %s1453_s10 }
0x1914   :  { %v1447_v31 = vpop.eup %1446 }
0x1915   :  { %v1082_v32 = vadd.f32 1.0, %v1447_v31 }
0x1917   :  { %v1083_v33 = vmul.f32 0.5, %v1082_v32 }
0x1919   :  { %v1085_v36 = vmul.f32 %v1083_v33, %v997_v17 }
0x1985   :  { %v1088_v34 = vpop.permute.xlu0 %1087 }
0x1986   :  { %v1090_v35 = vmul.f32 %v1088_v34, %v1083_v33 }
0x1988   :  { %1092 = vrot.lane.b32.xlu1 %v1090_v35, %s1454_s1 }
0x19fa   :  { %v1093_v7 = vpop.permute.xlu1 %1092 }
0x19fb   :  { %v1095_v37 = vadd.f32 %v1093_v7, %v1085_v36 }
0x19fd   :  { %1448 = vtanh.f32 %v1095_v37 }
0x1a0a   :  { %v1449_v41 = vpop.eup %1448 }
0x1a0b   :  { %1098 = vrot.lane.b32.xlu0 %v1449_v41, %s1453_s10 }
0x1a7d   :  { %v1099_v43 = vpop.permute.xlu0 %1098 }
0x1a7e   :  { %v1101_v1 = vmul.f32 %v1099_v43, %v1083_v33 }
0x1a80   :  { %1114 = vrot.lane.b32.xlu1 %v1101_v1, %s1454_s1 }
0x1af2   :  { %v1115_v44 = vpop.permute.xlu1 %1114 }
0x1af3   :  { %1381 = vmatmul.mubr.msk.f32.vlgmr.msra.gmra.mxu0 %vm123_vm1, %v1115_v44 }
0x1bb3   :  { %v1184_v46 = vpop.f32.mrf.mxu0 }
0x1bb4   :  { %v1185_v0 = vadd.f32 %v1205_v45, %v1184_v46 }
0x1bb5   :  { %v1382_v47 = vpop.f32.mrf.mxu0 }
0x1bb6   :  { %1189 = vst.msk [vmem:[%s1751_s6] sm:$0xff] %vm1188_vm2, %v1185_v0 }

</bundles_post_ra>
